<compile_context>
chip_gen: v7x
topology: tpu7x:2x2x1
jax: 0.10.0
libtpu: 0.0.40
codegen_flags: <defaults>
</compile_context>

<pallas_src>
import math

import jax
import jax.numpy as jnp
from jax.experimental import pallas as pl
from jax.experimental.pallas import tpu as pltpu

# ---- model config (small, synthetic) ----
B = 2             # batch
S = 8             # seq_len
H = 32            # hidden_size
NH = 4            # num_heads
HD = H // NH      # head_dim


def mha_kernel(xT_ref, mask_ref, wqkvT_ref, bqkvT_ref, wo_ref, bo_ref, o_ref):
    """One batch element per grid step.

    xT_ref    : (1, H, S)  f32   input activations, pre-transposed
    mask_ref  : (1, 1, S)  f32   additive key mask for this batch element
    wqkvT_ref : (3H, H)    bf16  fused QKV weight (transposed, Q block pre-scaled)
    bqkvT_ref : (3H, 1)    f32   fused QKV bias   (transposed, Q block pre-scaled)
    wo_ref    : (H, H)     bf16  output projection weight, (in, out) layout
    bo_ref    : (1, H)     f32   output projection bias
    o_ref     : (1, S, H)  f32   output
    """
    xT = xT_ref[0].astype(jnp.bfloat16)                          # (H, S)

    # Fused Q/K/V projection in transposed form: (3H, H) @ (H, S) -> (3H, S).
    qkvT = jnp.dot(wqkvT_ref[...], xT,
                   preferred_element_type=jnp.float32) + bqkvT_ref[...]

    # Head split: sublane slice + free major-dim reshape + batched minor transpose.
    def heads(t):                                                # (H, S) -> (NH, S, HD)
        return jnp.transpose(t.reshape(NH, HD, S), (0, 2, 1))

    qh = heads(qkvT[0 * H:1 * H]).astype(jnp.bfloat16)
    kh = heads(qkvT[1 * H:2 * H]).astype(jnp.bfloat16)
    vh = heads(qkvT[2 * H:3 * H]).astype(jnp.bfloat16)

    # Scaled dot-product attention (1/sqrt(head_dim) already folded into Q).
    scores = jnp.einsum("nqd,nkd->nqk", qh, kh,
                        preferred_element_type=jnp.float32)      # (NH, S, S)
    scores = scores + mask_ref[...]                              # (1, 1, S) broadcast

    m = jnp.max(scores, axis=-1, keepdims=True)
    p = jnp.exp(scores - m)
    denom = jnp.sum(p, axis=-1, keepdims=True)
    p = p * pl.reciprocal(denom)                                 # exact reciprocal
    # TODO(synk): training-mode attention dropout (pltpu.prng_*) not implemented;
    # the reference's F.dropout(..., training=False) is an inference no-op.

    ctx = jnp.einsum("nqk,nkd->nqd", p.astype(jnp.bfloat16), vh,
                     preferred_element_type=jnp.float32)         # (NH, S, HD)

    # Merge heads: batched minor transpose + free major reshape + one 2-D transpose.
    attn = jnp.transpose(ctx, (0, 2, 1)).reshape(H, S).T         # (S, H)

    # Output projection.
    o_ref[0] = (jnp.dot(attn.astype(jnp.bfloat16), wo_ref[...],
                        preferred_element_type=jnp.float32) + bo_ref[...])


def pack_mha_params(params):
    """One-time parameter prep, hoisted out of the forward pass."""
    wq, bq, wk, bk, wv, bv, wo, bo = params
    scale = 1.0 / math.sqrt(float(HD))
    # Fused QKV, transposed to (3H, H)/(3H, 1); softmax scale folded into Q.
    wqkvT = jnp.concatenate([wq * scale, wk, wv], axis=1).T.astype(jnp.bfloat16)
    bqkvT = jnp.concatenate([bq * scale, bk, bv], axis=1).T       # (3H, 1) f32
    return wqkvT, bqkvT, wo.astype(jnp.bfloat16), bo


@jax.jit
def multi_head_attention(x, attention_mask, packed):
    wqkvT, bqkvT, wo_bf16, bo = packed
    xT = jnp.transpose(x, (0, 2, 1))                  # (B, H, S)
    mask3 = attention_mask.reshape(B, 1, S)           # (B, 1, S)

    return pl.pallas_call(
        mha_kernel,
        grid=(B,),
        out_shape=jax.ShapeDtypeStruct((B, S, H), jnp.float32),
        in_specs=[
            pl.BlockSpec((1, H, S), lambda b: (b, 0, 0)),      # xT, per batch
            pl.BlockSpec((1, 1, S), lambda b: (b, 0, 0)),      # mask, per batch
            pl.BlockSpec((3 * H, H), lambda b: (0, 0)),        # fused QKV weight
            pl.BlockSpec((3 * H, 1), lambda b: (0, 0)),        # fused QKV bias
            pl.BlockSpec((H, H), lambda b: (0, 0)),            # out-proj weight
            pl.BlockSpec((1, H), lambda b: (0, 0)),            # out-proj bias
        ],
        out_specs=pl.BlockSpec((1, S, H), lambda b: (b, 0, 0)),
        compiler_params=pltpu.CompilerParams(
            dimension_semantics=("parallel",)),
    )(xT, mask3, wqkvT, bqkvT, wo_bf16, bo)


# ---- pure-JAX reference (matches the PyTorch MultiHeadAttention.forward) ----
def reference(x, mask, params):
    wq, bq, wk, bk, wv, bv, wo, bo = params
    q = (x @ wq + bq).reshape(B, S, NH, HD).transpose(0, 2, 1, 3)
    k = (x @ wk + bk).reshape(B, S, NH, HD).transpose(0, 2, 1, 3)
    v = (x @ wv + bv).reshape(B, S, NH, HD).transpose(0, 2, 1, 3)
    scores = jnp.einsum("bhqd,bhkd->bhqk", q, k) / math.sqrt(float(HD))
    scores = scores + mask[:, None, None, :]
    p = jax.nn.softmax(scores, axis=-1)
    ctx = jnp.einsum("bhqk,bhkd->bhqd", p, v).transpose(0, 2, 1, 3).reshape(B, S, H)
    return ctx @ wo + bo


if __name__ == "__main__":
    key = jax.random.PRNGKey(0)
    keys = jax.random.split(key, 6)

    x = jax.random.normal(keys[0], (B, S, H), dtype=jnp.float32)
    # additive attention mask (B, S): last two key positions of batch 1 masked out
    mask = jnp.zeros((B, S), dtype=jnp.float32)
    mask = mask.at[1, -2:].set(-10000.0)

    def init_linear(k, fan_in, fan_out):
        lim = 1.0 / math.sqrt(fan_in)
        kw, kb = jax.random.split(k)
        w = jax.random.uniform(kw, (fan_in, fan_out), jnp.float32, -lim, lim)
        b = jax.random.uniform(kb, (1, fan_out), jnp.float32, -lim, lim)
        return w, b

    wq, bq = init_linear(keys[1], H, H)
    wk, bk = init_linear(keys[2], H, H)
    wv, bv = init_linear(keys[3], H, H)
    wo, bo = init_linear(keys[4], H, H)
    params = (wq, bq, wk, bk, wv, bv, wo, bo)

    packed = pack_mha_params(params)        # one-time param packing (hoisted)

    out = jax.block_until_ready(multi_head_attention(x, mask, packed))
    ref = jax.block_until_ready(reference(x, mask, params))

    assert out.shape == (B, S, H)
    # Tolerance accounts for bf16 MXU operands (with f32 accumulation) vs. the
    # all-f32 reference; the softmax reciprocal itself is exact.
    assert jnp.allclose(out, ref, atol=3e-2, rtol=3e-2), "mismatch vs JAX reference"

    print("KERNEL_OK")
</pallas_src>

<mosaic_0001>
module attributes {stable_mosaic.version = 11 : i64} {
  func.func @mha_kernel(%arg0: i32, %arg1: memref<1x32x8xf32, #tpu.memory_space<vmem>>, %arg2: memref<1x1x8xf32, #tpu.memory_space<vmem>>, %arg3: memref<96x32xbf16, #tpu.memory_space<vmem>>, %arg4: memref<96x1xf32, #tpu.memory_space<vmem>>, %arg5: memref<32x32xbf16, #tpu.memory_space<vmem>>, %arg6: memref<1x32xf32, #tpu.memory_space<vmem>>, %arg7: memref<1x8x32xf32, #tpu.memory_space<vmem>>) attributes {dimension_semantics = [#tpu.dimension_semantics<parallel>], iteration_bounds = array<i64: 2>, scalar_prefetch = 0 : i64, scratch_operands = 0 : i64, tpu.core_type = #tpu.core_type<tc>, window_params = [{transform_indices = @transform_0, window_bounds = array<i64: 1, 32, 8>}, {transform_indices = @transform_1, window_bounds = array<i64: 1, 1, 8>}, {pipeline_mode = #tpu.pipeline_mode<synchronous>, transform_indices = @transform_2, window_bounds = array<i64: 96, 32>}, {pipeline_mode = #tpu.pipeline_mode<synchronous>, transform_indices = @transform_3, window_bounds = array<i64: 96, 1>}, {pipeline_mode = #tpu.pipeline_mode<synchronous>, transform_indices = @transform_4, window_bounds = array<i64: 32, 32>}, {pipeline_mode = #tpu.pipeline_mode<synchronous>, transform_indices = @transform_5, window_bounds = array<i64: 1, 32>}, {transform_indices = @transform_6, window_bounds = array<i64: 1, 8, 32>}]} {
    %c0 = arith.constant 0 : index
    %c0_0 = arith.constant 0 : index
    %c0_1 = arith.constant 0 : index
    %0 = vector.load %arg1[%c0, %c0_0, %c0_1] : memref<1x32x8xf32, #tpu.memory_space<vmem>>, vector<1x32x8xf32>
    %1 = vector.shape_cast %0 : vector<1x32x8xf32> to vector<32x8xf32>
    %2 = arith.truncf %1 : vector<32x8xf32> to vector<32x8xbf16>
    %c0_2 = arith.constant 0 : index
    %c0_3 = arith.constant 0 : index
    %3 = vector.load %arg3[%c0_2, %c0_3] : memref<96x32xbf16, #tpu.memory_space<vmem>>, vector<96x32xbf16>
    %cst = arith.constant dense<0.000000e+00> : vector<96x8xf32>
    %4 = tpu.matmul %3, %2, %cst {dimension_numbers = #tpu.dot_dimension_numbers<[1], [0], [0], [1], [0, 0, 1, 1], [], []>} : vector<96x32xbf16>, vector<32x8xbf16>, vector<96x8xf32> -> vector<96x8xf32>
    %c0_4 = arith.constant 0 : index
    %c0_5 = arith.constant 0 : index
    %5 = vector.load %arg4[%c0_4, %c0_5] : memref<96x1xf32, #tpu.memory_space<vmem>>, vector<96x1xf32>
    %6 = vector.broadcast %5 : vector<96x1xf32> to vector<96x8xf32>
    %7 = arith.addf %4, %6 : vector<96x8xf32>
    %8 = vector.extract_strided_slice %7 {offsets = [0, 0], sizes = [32, 8], strides = [1, 1]} : vector<96x8xf32> to vector<32x8xf32>
    %9 = vector.shape_cast %8 : vector<32x8xf32> to vector<4x8x8xf32>
    %10 = tpu.transpose %9, [0, 2, 1] : vector<4x8x8xf32> -> vector<4x8x8xf32>
    %11 = arith.truncf %10 : vector<4x8x8xf32> to vector<4x8x8xbf16>
    %12 = vector.extract_strided_slice %7 {offsets = [32, 0], sizes = [32, 8], strides = [1, 1]} : vector<96x8xf32> to vector<32x8xf32>
    %13 = vector.shape_cast %12 : vector<32x8xf32> to vector<4x8x8xf32>
    %14 = tpu.transpose %13, [0, 2, 1] : vector<4x8x8xf32> -> vector<4x8x8xf32>
    %15 = arith.truncf %14 : vector<4x8x8xf32> to vector<4x8x8xbf16>
    %16 = vector.extract_strided_slice %7 {offsets = [64, 0], sizes = [32, 8], strides = [1, 1]} : vector<96x8xf32> to vector<32x8xf32>
    %17 = vector.shape_cast %16 : vector<32x8xf32> to vector<4x8x8xf32>
    %18 = tpu.transpose %17, [0, 2, 1] : vector<4x8x8xf32> -> vector<4x8x8xf32>
    %19 = arith.truncf %18 : vector<4x8x8xf32> to vector<4x8x8xbf16>
    "tpu.trace_start"() <{level = 10 : i32, message = "nqd,nkd->nqk"}> : () -> ()
    %cst_6 = arith.constant dense<0.000000e+00> : vector<4x8x8xf32>
    %20 = tpu.matmul %11, %15, %cst_6 {dimension_numbers = #tpu.dot_dimension_numbers<[2], [2], [1], [1], [0, 0, 0, 1, 1, 1], [0], [0]>} : vector<4x8x8xbf16>, vector<4x8x8xbf16>, vector<4x8x8xf32> -> vector<4x8x8xf32>
    "tpu.trace_stop"() : () -> ()
    %c0_7 = arith.constant 0 : index
    %c0_8 = arith.constant 0 : index
    %c0_9 = arith.constant 0 : index
    %21 = vector.load %arg2[%c0_7, %c0_8, %c0_9] : memref<1x1x8xf32, #tpu.memory_space<vmem>>, vector<1x1x8xf32>
    %22 = vector.broadcast %21 : vector<1x1x8xf32> to vector<4x8x8xf32>
    %23 = arith.addf %20, %22 : vector<4x8x8xf32>
    %cst_10 = arith.constant dense<0xFF800000> : vector<4x8xf32>
    %24 = vector.multi_reduction <maximumf>, %23, %cst_10 [2] : vector<4x8x8xf32> to vector<4x8xf32>
    %25 = vector.shape_cast %24 : vector<4x8xf32> to vector<4x8x1xf32>
    %26 = vector.broadcast %25 : vector<4x8x1xf32> to vector<4x8x8xf32>
    %27 = arith.subf %23, %26 : vector<4x8x8xf32>
    %28 = math.exp %27 : vector<4x8x8xf32>
    %cst_11 = arith.constant dense<0.000000e+00> : vector<4x8xf32>
    %29 = vector.multi_reduction <add>, %28, %cst_11 [2] : vector<4x8x8xf32> to vector<4x8xf32>
    %30 = vector.shape_cast %29 : vector<4x8xf32> to vector<4x8x1xf32>
    %31 = tpu.reciprocal %30 : vector<4x8x1xf32> -> vector<4x8x1xf32>
    %32 = vector.broadcast %31 : vector<4x8x1xf32> to vector<4x8x8xf32>
    %33 = arith.mulf %28, %32 : vector<4x8x8xf32>
    %34 = arith.truncf %33 : vector<4x8x8xf32> to vector<4x8x8xbf16>
    "tpu.trace_start"() <{level = 10 : i32, message = "nqk,nkd->nqd"}> : () -> ()
    %cst_12 = arith.constant dense<0.000000e+00> : vector<4x8x8xf32>
    %35 = tpu.matmul %34, %19, %cst_12 {dimension_numbers = #tpu.dot_dimension_numbers<[2], [1], [1], [2], [0, 0, 0, 1, 1, 2], [0], [0]>} : vector<4x8x8xbf16>, vector<4x8x8xbf16>, vector<4x8x8xf32> -> vector<4x8x8xf32>
    "tpu.trace_stop"() : () -> ()
    %36 = tpu.transpose %35, [0, 2, 1] : vector<4x8x8xf32> -> vector<4x8x8xf32>
    %37 = vector.shape_cast %36 : vector<4x8x8xf32> to vector<32x8xf32>
    %38 = tpu.transpose %37, [1, 0] : vector<32x8xf32> -> vector<8x32xf32>
    %39 = arith.truncf %38 : vector<8x32xf32> to vector<8x32xbf16>
    %c0_13 = arith.constant 0 : index
    %c0_14 = arith.constant 0 : index
    %40 = vector.load %arg5[%c0_13, %c0_14] : memref<32x32xbf16, #tpu.memory_space<vmem>>, vector<32x32xbf16>
    %cst_15 = arith.constant dense<0.000000e+00> : vector<8x32xf32>
    %41 = tpu.matmul %39, %40, %cst_15 {dimension_numbers = #tpu.dot_dimension_numbers<[1], [0], [0], [1], [0, 0, 1, 1], [], []>} : vector<8x32xbf16>, vector<32x32xbf16>, vector<8x32xf32> -> vector<8x32xf32>
    %c0_16 = arith.constant 0 : index
    %c0_17 = arith.constant 0 : index
    %42 = vector.load %arg6[%c0_16, %c0_17] : memref<1x32xf32, #tpu.memory_space<vmem>>, vector<1x32xf32>
    %43 = vector.broadcast %42 : vector<1x32xf32> to vector<8x32xf32>
    %44 = arith.addf %41, %43 : vector<8x32xf32>
    %c0_18 = arith.constant 0 : index
    %c0_19 = arith.constant 0 : index
    %c0_20 = arith.constant 0 : index
    %45 = vector.load %arg7[%c0_18, %c0_19, %c0_20] : memref<1x8x32xf32, #tpu.memory_space<vmem>>, vector<1x8x32xf32>
    %46 = vector.shape_cast %45 : vector<1x8x32xf32> to vector<8x32xf32>
    %47 = vector.shape_cast %44 : vector<8x32xf32> to vector<1x8x32xf32>
    tpu.vector_store %arg7[%c0_18, %c0_19, %c0_20], %47 {strides = array<i32>} : memref<1x8x32xf32, #tpu.memory_space<vmem>>, vector<1x8x32xf32>,
    return
  }
  func.func @transform_0(%arg0: i32) -> (i32, i32, i32) {
    %c0_i32 = arith.constant 0 : i32
    %c0_i32_0 = arith.constant 0 : i32
    %c0_i32_1 = arith.constant 0 : i32
    return %arg0, %c0_i32, %c0_i32_0 : i32, i32, i32
  }
  func.func @transform_1(%arg0: i32) -> (i32, i32, i32) {
    %c0_i32 = arith.constant 0 : i32
    %c0_i32_0 = arith.constant 0 : i32
    %c0_i32_1 = arith.constant 0 : i32
    return %arg0, %c0_i32, %c0_i32_0 : i32, i32, i32
  }
  func.func @transform_2(%arg0: i32) -> (i32, i32) {
    %c0_i32 = arith.constant 0 : i32
    %c0_i32_0 = arith.constant 0 : i32
    %c0_i32_1 = arith.constant 0 : i32
    return %c0_i32, %c0_i32_0 : i32, i32
  }
  func.func @transform_3(%arg0: i32) -> (i32, i32) {
    %c0_i32 = arith.constant 0 : i32
    %c0_i32_0 = arith.constant 0 : i32
    %c0_i32_1 = arith.constant 0 : i32
    return %c0_i32, %c0_i32_0 : i32, i32
  }
  func.func @transform_4(%arg0: i32) -> (i32, i32) {
    %c0_i32 = arith.constant 0 : i32
    %c0_i32_0 = arith.constant 0 : i32
    %c0_i32_1 = arith.constant 0 : i32
    return %c0_i32, %c0_i32_0 : i32, i32
  }
  func.func @transform_5(%arg0: i32) -> (i32, i32) {
    %c0_i32 = arith.constant 0 : i32
    %c0_i32_0 = arith.constant 0 : i32
    %c0_i32_1 = arith.constant 0 : i32
    return %c0_i32, %c0_i32_0 : i32, i32
  }
  func.func @transform_6(%arg0: i32) -> (i32, i32, i32) {
    %c0_i32 = arith.constant 0 : i32
    %c0_i32_0 = arith.constant 0 : i32
    %c0_i32_1 = arith.constant 0 : i32
    return %arg0, %c0_i32, %c0_i32_0 : i32, i32, i32
  }
}

</mosaic_0001>

<bundles_post_ra>
// kernel: multi_head_attention.1
= control target key start
LH: loop header
LB: loop body
LE: loop exit
PB: predicated region body
PF: predicated region fallthrough
CT: control target
= control target key end

     0   :  { %11 = vsyncpa [#allocation3], 0  ;;  %s2179_s0 = inlined_call_operand.vmem [shape: f32[2,32,8], index: 0, kind: input, shape index: {}]   ;;  %s2180_s1 = inlined_call_operand.vmem [shape: f32[2,1,8], index: 1, kind: input, shape index: {}]   ;;  %s2181_s2 = inlined_call_operand.vmem [shape: bf16[96,32], index: 2, kind: input, shape index: {}]   ;;  %s2182_s3 = inlined_call_operand.vmem [shape: f32[96,1], index: 3, kind: input, shape index: {}]   ;;  %s2183_s4 = inlined_call_operand.vmem [shape: bf16[32,32], index: 4, kind: input, shape index: {}]   ;;  %s2184_s5 = inlined_call_operand.vmem [shape: f32[1,32], index: 5, kind: input, shape index: {}]   ;;  %s2185_s6 = inlined_call_operand.hbm [shape: f32[2,8,32], index: 6, kind: output, shape index: {}]  }
   0x1   :  { %13 = vsyncpa [#allocation3 + $0x1], 0  ;;  %s1937_s21 = smov 0   ;;  %s1939_s22 = smov 0  }
   0x2   :  { %s1941_s23 = smov 0   ;;  %s1943_s24 = smov 0  }
   0x3 LB: > { %s1958_s25 = sadd.s32 4294967295, %s1896_s24   ;;  %s1616_s26 = sadd.s32 4294967294, %s1896_s24   ;;  %s1896_s24 = sphi %s1943_s24, %s2191_s24   ;;  %s1892_s23 = sphi %s1941_s23, %s2190_s23   ;;  %s1888_s22 = sphi %s1939_s22, %s2189_s22   ;;  %s1884_s21 = sphi %s1937_s21, %s2188_s21  }
   0x4   : > { %s1962_s27 = sadd.s32 1, %s1896_s24   ;;  %s162_s28 = sadd.s32 1, %s1892_s23 }
   0x5   : > { %s159_s29 = ssub.s32 %s1896_s24, %s1962_s27  ;;  %p172_p0 = scmp.ne.s32.totalorder %s1892_s23, %s1888_s22 }
   0x6   : > { %p160_p1 = scmp.eq.s32.totalorder %s159_s29, 0  ;;  %p173_p2 = scmp.eq.s32.totalorder %s1958_s25, 1 }
   0x7   : > { %p178_p3 = scmp.ne.s32.totalorder %s1888_s22, %s1884_s21  ;;  %p179_p4 = scmp.eq.s32.totalorder %s1616_s26, 1 }
   0x8   : > { %s1973_s30 = scalar_select %p160_p1, %s1892_s23, %s162_s28  }
   0x9   : > { %p1975_p5 = por %p173_p2, %p172_p0  ;;  %p1979_p6 = por %p179_p4, %p178_p3 }
   0xa   : > { %p1619_p7 = scmp.ge.s32.totalorder %s1896_s24, 1  ;;  %p223_p8 = scmp.lt.s32.totalorder %s1896_s24, 3 }
   0xc   : > { %p224_p9 = pnand %p1619_p7, %p223_p8 }
   0xd   : > { %p256_p10 = scmp.lt.s32.totalorder (!%p224_p9), %s1958_s25, 1  ;;  %v1810_v0 = vld [vmem:[%s2181_s2] sm:$0xff] (!%p224_p9)   ;;  %vm385_vm0 = vcmask (!%p224_p9), 261120   ;;  %v1898_v1 = vmov (!%p224_p9), 0   ;;  %v288_v3 = vld [vmem:[%s2182_s3 + $0x28] sm:$0xff] (!%p224_p9)  ;;  %v289_v12 = vld [vmem:[%s2182_s3 + $0x30] sm:$0xff] (!%p224_p9) }
   0xe   : > { %227 = sbr.rel (%p224_p9) target bundleno = 1666 (0x682), region = 44  ;;  %1684 = vmatprep.mubr.msk.bf16.mxu0 (!%p224_p9), %vm385_vm0, %v1810_v0  ;;  %1794 = vset.pattern.permute.xlu0 (!%p224_p9), %v1898_v1  ;;  %v287_v2 = vld [vmem:[%s2182_s3 + $0x20] sm:$0xff] (!%p224_p9)  ;;  %v284_v10 = vld [vmem:[%s2182_s3 + $0x8] sm:$0xff] (!%p224_p9)  ;;  %v290_v13 = vld [vmem:[%s2182_s3 + $0x38] sm:$0xff] (!%p224_p9)  ;;  %v1899_v40 = vmov (!%p224_p9), 0.0   ;;  %vm1900_vm1 = vmmov (!%p224_p9), 0  }
   0xf   : > { %1795 = vset.pattern.permute.xlu1 (!%p224_p9), %v1898_v1  ;;  %317 = vperm.xlu0 (!%p224_p9), %1794, %v287_v2   ;;  %v283_v4 = vld [vmem:[%s2182_s3] sm:$0xff] (!%p224_p9)  ;;  %v1811_v14 = vld [vmem:[%s2181_s2 + $0x8] sm:$0xff] (!%p224_p9)   ;;  %v1812_v15 = vld [vmem:[%s2181_s2 + $0x10] sm:$0xff] (!%p224_p9)   ;;  %vm888_vm2 = vcmask (!%p224_p9), 64512   ;;  %vm1124_vm3 = vcmask (!%p224_p9), 1043456   ;;  %s253_s14 = sand.u32 (!%p224_p9), 1, %s1888_s22  }
  0x10   : > { %322 = vperm.xlu1 (!%p224_p9), %1795, %v288_v3   ;;  %v285_v16 = vld [vmem:[%s2182_s3 + $0x10] sm:$0xff] (!%p224_p9)  ;;  %v286_v17 = vld [vmem:[%s2182_s3 + $0x18] sm:$0xff] (!%p224_p9)  ;;  %1696 = vmatprep.subr.bf16.mxu1 (!%p224_p9), %v1899_v40  ;;  %v1814_v45 = vld [vmem:[%s2181_s2 + $0x20] sm:$0xff] (!%p224_p9)   ;;  %s1620_s15 = sshll.u32 (!%p224_p9), %s253_s14, 3  ;;  %s1649_s17 = sshll.u32 (!%p224_p9), %s1958_s25, 7 }
  0x11   : > { %v1813_v18 = vld [vmem:[%s2181_s2 + $0x18] sm:$0xff] (!%p224_p9)   ;;  %v1815_v46 = vld [vmem:[%s2181_s2 + $0x28] sm:$0xff] (!%p224_p9)   ;;  %1698 = vmatprep.mubr.msk.bf16.mxu1 (!%p224_p9), %vm1900_vm1, %v1899_v40  ;;  %s255_s18 = scalar_lea.vmem (!%p224_p9), [#allocation2], %s1620_s15  ;;  %s2136_s28 = scalar_lea.hbm (!%p224_p9), %s2185_s6, %s1649_s17 }
  0x12   : > { %s1901_s9 = smov (!%p224_p9), [#allocation2]  }
  0x13   : > { %297 = vperm.xlu0 (!%p224_p9), %1794, %v283_v4   ;;  %s1838_s10 = sshll.u32 (!%p224_p9), %s1901_s9, 4  ;;  %s1839_s10 = int_to_ptr.vmem [resolvable:$false] %s1838_s10 }
  0x14   : > { %302 = vperm.xlu1 (!%p224_p9), %1795, %v284_v10  }
  0x15   : > { %s1990_s11 = scalar_select %p256_p10, %s1958_s25, 1 }
  0x16   : > { %s1535_s25 = scalar_lea.sflag [#allocation3], %s253_s14 }
  0x17   : > { %s1652_s12 = sshll.u32 %s1990_s11, 5  ;;  %327 = vperm.xlu0 %1794, %v289_v12   ;;  %s263_s16 = scalar_lea.vmem %s2180_s1, %s1990_s11 }
  0x18   : > { %s260_s19 = scalar_lea.vmem %s2179_s0, %s1652_s12  ;;  %332 = vperm.xlu1 %1795, %v290_v13   ;;  %v1635_v10 = vld [vmem:[%s263_s16] ss:$0 sm:$0xff]  ;;  %s1840_s12 = scalar_lea.vmem %s1839_s10, 256 }
  0x19   : > { %v265_v5 = vld [vmem:[%s260_s19] sm:$0xff]  ;;  %v266_v6 = vld [vmem:[%s260_s19 + $0x8] sm:$0xff]  ;;  %v267_v7 = vld [vmem:[%s260_s19 + $0x10] sm:$0xff] }
  0x1a   : > { %v269_v8 = vpack.c.bf16 %v266_v6, %v265_v5  ;;  %v268_v9 = vld [vmem:[%s260_s19 + $0x18] sm:$0xff]  ;;  %s1548_s19 = sshll.u32 %s255_s18, 4  ;;  %s2138_s19 = int_to_ptr.vmem [resolvable:$true] %s1548_s19 }
  0x1b   : > { %v270_v11 = vpack.c.bf16 %v268_v9, %v267_v7  ;;  %307 = vperm.xlu0 %1794, %v285_v16   ;;  %s1834_s29 = scalar_lea.vmem %s2138_s19, 128  ;;  %p1841_p0 = scmp.lt.s32.totalorder %s2138_s19, %s1839_s10 }
  0x1c   : > { %1680 = vmatprep.subr.bf16.mxu0 %v269_v8  ;;  %312 = vperm.xlu1 %1795, %v286_v17   ;;  %p1835_p11 = scmp.ne.s32.totalorder %s2138_s19, %s1834_s29  ;;  %p1842_p1 = scmp.lt.s32.totalorder %s1840_s12, %s1834_s29 }
  0x1d   : > { %1681 = vmatpush3.bf16.msra.mxu0 %v269_v8 }
  0x1e   : > { %1682 = vmatprep.subr.bf16.mxu0 %v270_v11  ;;  %p1836_p12 = pnand %p1835_p11, %p1975_p5  ;;  %p1843_p2 = por %p1842_p1, %p1841_p0 }
  0x20   : > { %p1837_p13 = pneg %p1836_p12 }
  0x21   : > { %1683 = vmatpush3.bf16.msra.mxu0 %v270_v11 }
  0x22   : > { %1714 = vmatprep.subr.bf16.mxu0 %v1899_v40  ;;  %p1844_p3 = pnand %p1843_p2, %p1837_p13 }
  0x24   : > { %1685 = vmatmul.mubr.msk.bf16.vlgmr.msra.gmra.mrb[0].mxu0 %vm385_vm0, %v1811_v14 }
  0x25   : > { %1688 = vmatprep.mubr.msk.bf16.mxu0 %vm385_vm0, %v1812_v15 }
  0x2c   : > { %1689 = vmatmul.mubr.msk.bf16.gmra.mrb[4].mxu0 %vm385_vm0, %v1813_v18 }
  0x2d   : > { %1692 = vmatprep.mubr.msk.bf16.mxu0 %vm385_vm0, %v1814_v45 }
  0x34   : > { %1693 = vmatmul.mubr.msk.bf16.gmra.mrb[8].mxu0 %vm385_vm0, %v1815_v46 }
  0x35   : > { %1716 = vmatprep.mubr.msk.bf16.mxu0 %vm1900_vm1, %v1899_v40 }
  0x8e   : > { %v318_v19 = vpop.permute.xlu0 %317 }
  0x8f   : > { %v323_v20 = vpop.permute.xlu1 %322 }
  0x92   : > { %v298_v23 = vpop.permute.xlu0 %297 }
  0x93   : > { %v303_v25 = vpop.permute.xlu1 %302 }
  0x96   : > { %v328_v27 = vpop.permute.xlu0 %327 }
  0x97   : > { %v333_v29 = vpop.permute.xlu1 %332 }
  0x9a   : > { %v308_v44 = vpop.permute.xlu0 %307 }
  0x9b   : > { %v313_v41 = vpop.permute.xlu1 %312 }
  0xf7   : > { %v1686_v21 = vpop.f32.mrb[0].mxu0 }
  0xf8   : > { %v438_v22 = vpop.f32.mrb[1].mxu0  ;;  %v447_v47 = vadd.f32 %v1686_v21, %v308_v44 }
  0xf9   : > { %v1687_v24 = vpop.f32.mrb[2].mxu0  ;;  %v439_v37 = vadd.f32 %v438_v22, %v298_v23 }
  0xfa   : > { %v441_v26 = vpop.f32.mrb[3].mxu0  ;;  %v450_v42 = vadd.f32 %v1687_v24, %v313_v41 }
  0xfb   : > { %v442_v30 = vadd.f32 %v441_v26, %v303_v25 }
  0xff   : > { %v1690_v28 = vpop.f32.mrb[4].mxu0 }
 0x100   : > { %v463_v31 = vadd.f32 %v1690_v28, %v328_v27  ;;  %v454_v32 = vpop.f32.mrb[5].mxu0 }
 0x101   : > { %v455_v33 = vadd.f32 %v454_v32, %v318_v19  ;;  %v1691_v34 = vpop.f32.mrb[6].mxu0 }
 0x102   : > { %v1803_v35 = vpack.i.bf16 %v463_v31, %v442_v30  ;;  %v457_v36 = vpop.f32.mrb[7].mxu0  ;;  %v466_v43 = vadd.f32 %v1691_v34, %v333_v29 }
 0x103   : > { %v458_v38 = vadd.f32 %v457_v36, %v323_v20  ;;  %617 = vxpose.xlu0.b32.start.end [1/1] (short) (narrow) %v455_v33, 8  ;;  %v291_v36 = vld [vmem:[%s2182_s3 + $0x40] sm:$0xff] }
 0x105   : > { %v1796_v39 = vpack.i.bf16 %v458_v38, %v439_v37  ;;  %v293_v37 = vld [vmem:[%s2182_s3 + $0x50] sm:$0xff]  ;;  %v294_v38 = vld [vmem:[%s2182_s3 + $0x58] sm:$0xff] }
 0x107   : > { %1804 = vxpose.xlu0.b32.start.end [1/1] (short) (narrow) %v1803_v35, 8  ;;  %1797 = vxpose.xlu1.b32.start.end [1/1] (short) (narrow) %v1796_v39, 8  ;;  %v2067_v6 = vpop.f32.mrb[8].mxu0  ;;  %v292_v35 = vld [vmem:[%s2182_s3 + $0x48] sm:$0xff] }
 0x108   : > { %v2069_v7 = vpop.f32.mrb[9].mxu0 }
 0x109   : > { %v2071_v8 = vpop.f32.mrb[10].mxu0 }
 0x10a   : > { %v2073_v9 = vpop.f32.mrb[11].mxu0 }
 0x10b   : > { %713 = vxpose.xlu0.b32.start.end [1/1] (short) (narrow) %v466_v43, 8  ;;  %581 = vxpose.xlu1.b32.start.end [1/1] (short) (narrow) %v450_v42, 8 }
 0x10f   : > { %549 = vxpose.xlu0.b32.start.end [1/1] (short) (narrow) %v447_v47, 8 }
 0x183   : > { %v633_v48 = vpop.trf.xlu0 }
 0x184   : > { %v745_v49 = vpack.c.bf16 %v633_v48, %v633_v48 }
 0x186   : > { %v893_v50 = vsel %vm888_vm2, %v745_v49, 0 }
 0x187   : > { %1697 = vmatpush3.bf16.xpose.msra.mxu1 %v893_v50  ;;  %v1805_v51 = vpop.trf.xlu0  ;;  %v1798_v52 = vpop.trf.xlu1 }
 0x188   : > { %1702 = vmatprep.subr.bf16.mxu1 %v1899_v40  ;;  %v1802_v53 = vunpack.i.h.bf16 %v1798_v52  ;;  %v1799_v54 = vunpack.i.l.bf16 %v1798_v52  ;;  %v1809_v60 = vunpack.i.h.bf16 %v1805_v51  ;;  %v1806_v63 = vunpack.i.l.bf16 %v1805_v51 }
 0x18a   : > { %v613_v55 = vpack.c.bf16 %v1799_v54, %v1799_v54  ;;  %v746_v57 = vpack.c.bf16 %v1802_v53, %v1802_v53  ;;  %v747_v1 = vpack.c.bf16 %v1809_v60, %v1809_v60  ;;  %v614_v2 = vpack.c.bf16 %v1806_v63, %v1806_v63 }
 0x18b   : > { %v729_v56 = vpop.trf.xlu0  ;;  %v597_v62 = vpop.trf.xlu1 }
 0x18c   : > { %v748_v58 = vpack.c.bf16 %v729_v56, %v729_v56  ;;  %v939_v59 = vsel %vm888_vm2, %v746_v57, 0  ;;  %v616_v0 = vpack.c.bf16 %v597_v62, %v597_v62  ;;  %v985_v3 = vsel %vm888_vm2, %v747_v1, 0 }
 0x18e   : > { %v1031_v61 = vsel %vm888_vm2, %v748_v58, 0  ;;  %1699 = vmatmul.mubr.msk.bf16.vlgmr.msra.gmra.mrb[0].mxu1 %vm888_vm2, %v613_v55 }
 0x18f   : > { %1703 = vmatpush3.bf16.xpose.msra.mxu1 %v939_v59  ;;  %1715 = vmatpush3.bf16.xpose.msra.mxu0 %v1031_v61  ;;  %v565_v4 = vpop.trf.xlu0 }
 0x190   : > { %1704 = vmatprep.mubr.msk.bf16.mxu1 %vm1900_vm1, %v1899_v40  ;;  %1708 = vmatprep.subr.bf16.mxu1 %v1899_v40  ;;  %v615_v5 = vpack.c.bf16 %v565_v4, %v565_v4 }
 0x191   : > { %1726 = vmatprep.subr.bf16.mxu0 %v1899_v40 }
 0x196   : > { %1705 = vmatmul.mubr.msk.bf16.vlgmr.msra.gmra.mrb[4].mxu1 %vm888_vm2, %v614_v2  ;;  %1717 = vmatmul.mubr.msk.bf16.vlgmr.msra.gmra.mrb[12].mxu0 %vm888_vm2, %v616_v0 }
 0x197   : > { %1709 = vmatpush3.bf16.xpose.msra.mxu1 %v985_v3  ;;  %1710 = vmatprep.mubr.msk.bf16.mxu1 %vm1900_vm1, %v1899_v40 }
 0x198   : > { %1720 = vmatprep.subr.bf16.mxu1 %v1899_v40  ;;  %1728 = vmatprep.mubr.msk.bf16.mxu0 %vm1900_vm1, %v1899_v40 }
 0x19e   : > { %1711 = vmatmul.mubr.msk.bf16.vlgmr.msra.gmra.mrb[8].mxu1 %vm888_vm2, %v615_v5 }
 0x19f   : > { %1722 = vmatprep.mubr.msk.bf16.mxu1 %vm1900_vm1, %v1899_v40 }
 0x261   : > { %v929_v11 = vpop.f32.mrb[0].mxu1 }
 0x262   : > { %v930_v12 = vadd.f32 %v1635_v10, %v929_v11  ;;  %v1700_v13 = vpop.f32.mrb[1].mxu1 }
 0x263   : > { %v932_v14 = vpop.f32.mrb[2].mxu1 }
 0x264   : > { %v1073_v15 = vsel %vm888_vm2, %v930_v12, -inf  ;;  %v1701_v16 = vpop.f32.mrb[3].mxu1 }
 0x265   : > { %1074 = vmax.xlane.f32.xlu0 %v1073_v15 }
 0x269   : > { %v975_v17 = vpop.f32.mrb[4].mxu1  ;;  %v1067_v18 = vpop.f32.mrb[12].mxu0 }
 0x26a   : > { %v976_v19 = vadd.f32 %v1635_v10, %v975_v17  ;;  %v1068_v20 = vadd.f32 %v1635_v10, %v1067_v18  ;;  %v1706_v21 = vpop.f32.mrb[5].mxu1  ;;  %v1718_v22 = vpop.f32.mrb[13].mxu0 }
 0x26b   : > { %v978_v23 = vpop.f32.mrb[6].mxu1  ;;  %v1070_v24 = vpop.f32.mrb[14].mxu0 }
 0x26c   : > { %v1707_v25 = vpop.f32.mrb[7].mxu1  ;;  %v1082_v26 = vsel %vm888_vm2, %v1068_v20, -inf  ;;  %v1076_v27 = vsel %vm888_vm2, %v976_v19, -inf  ;;  %v1719_v28 = vpop.f32.mrb[15].mxu0 }
 0x26d   : > { %1083 = vmax.xlane.f32.xlu0 %v1082_v26  ;;  %1077 = vmax.xlane.f32.xlu1 %v1076_v27 }
 0x271   : > { %v1021_v29 = vpop.f32.mrb[8].mxu1 }
 0x272   : > { %v1022_v30 = vadd.f32 %v1635_v10, %v1021_v29  ;;  %v1712_v31 = vpop.f32.mrb[9].mxu1 }
 0x273   : > { %v1024_v32 = vpop.f32.mrb[10].mxu1 }
 0x274   : > { %v1079_v33 = vsel %vm888_vm2, %v1022_v30, -inf  ;;  %v1713_v34 = vpop.f32.mrb[11].mxu1 }
 0x275   : > { %1080 = vmax.xlane.f32.xlu1 %v1079_v33 }
 0x283   : > { %342 = vperm.xlu0 %1794, %v292_v35  }
 0x286   : > { %337 = vperm.xlu1 %1795, %v291_v36  }
 0x28a   : > { %347 = vperm.xlu1 %1795, %v293_v37  }
 0x28e   : > { %352 = vperm.xlu1 %1795, %v294_v38  }
 0x2f2   : > { %v1075_v39 = vpop.xlane.xlu0 %1074 }
 0x2f3   : > { %v1085_v41 = vsub.f32 %v930_v12, %v1075_v39 }
 0x2f5   : > { %v1089_v42 = vmul.f32 1.442695, %v1085_v41 }
 0x2f7   : > { %1818 = vpow2.f32 %v1089_v42 }
 0x2fa   : > { %v1084_v43 = vpop.xlane.xlu0 %1083  ;;  %v1078_v44 = vpop.xlane.xlu1 %1077 }
 0x2fb   : > { %v1088_v45 = vsub.f32 %v1068_v20, %v1084_v43  ;;  %v1086_v46 = vsub.f32 %v976_v19, %v1078_v44 }
 0x2fd   : > { %v1095_v47 = vmul.f32 1.442695, %v1088_v45  ;;  %v1091_v48 = vmul.f32 1.442695, %v1086_v46 }
 0x2ff   : > { %1820 = vpow2.f32 %v1095_v47 }
 0x300   : > { %1822 = vpow2.f32 %v1091_v48 }
 0x301   : > { %v1819_v49 = vpop.eup %1818 }
 0x302   : > { %v1081_v50 = vpop.xlane.xlu1 %1080  ;;  %v1097_v51 = vsel %vm888_vm2, %v1819_v49, 0.0  ;;  %v343_v62 = vpop.permute.xlu0 %342 }
 0x303   : > { %v1087_v52 = vsub.f32 %v1022_v30, %v1081_v50  ;;  %1098 = vadd.xlane.f32.xlu0 %v1097_v51  ;;  %v474_v0 = vadd.f32 %v2073_v9, %v343_v62  ;;  %v1817_v50 = vld [vmem:[%s2183_s4 + $0x8] sm:$0xff]  }
 0x305   : > { %v1093_v53 = vmul.f32 1.442695, %v1087_v52 }
 0x306   : > { %v338_v60 = vpop.permute.xlu1 %337 }
 0x307   : > { %1824 = vpow2.f32 %v1093_v53  ;;  %v471_v63 = vadd.f32 %v2069_v7, %v338_v60 }
 0x309   : > { %v1821_v54 = vpop.eup %1820 }
 0x30a   : > { %v1823_v55 = vpop.eup %1822  ;;  %v1106_v56 = vsel %vm888_vm2, %v1821_v54, 0.0  ;;  %v348_v61 = vpop.permute.xlu1 %347 }
 0x30b   : > { %1107 = vadd.xlane.f32.xlu0 %v1106_v56  ;;  %v1100_v57 = vsel %vm888_vm2, %v1823_v55, 0.0  ;;  %v479_v3 = vadd.f32 %v2067_v6, %v348_v61 }
 0x30c   : > { %1101 = vadd.xlane.f32.xlu1 %v1100_v57 }
 0x30e   : > { %v353_v1 = vpop.permute.xlu1 %352 }
 0x30f   : > { %v482_v2 = vadd.f32 %v2071_v8, %v353_v1 }
 0x311   : > { %v1825_v58 = vpop.eup %1824 }
 0x312   : > { %v1103_v59 = vsel %vm888_vm2, %v1825_v58, 0.0 }
 0x313   : > { %1104 = vadd.xlane.f32.xlu0 %v1103_v59 }
 0x33f   : > { %749 = vxpose.xlu1.b32.start.end [1/1] (short) (narrow) %v471_v63, 8 }
 0x340   : > { %781 = vxpose.xlu0.b32.start.end [1/1] (short) (narrow) %v474_v0, 8 }
 0x343   : > { %845 = vxpose.xlu1.b32.start.end [1/1] (short) (narrow) %v482_v2, 8 }
 0x344   : > { %813 = vxpose.xlu0.b32.start.end [1/1] (short) (narrow) %v479_v3, 8 }
 0x390   : > { %v1099_v4 = vpop.xlane.xlu0 %1098 }
 0x391   : > { %1826 = vrcp.f32 %v1099_v4 }
 0x398   : > { %v1108_v10 = vpop.xlane.xlu0 %1107 }
 0x399   : > { %v1102_v5 = vpop.xlane.xlu1 %1101 }
 0x39a   : > { %1828 = vrcp.f32 %v1102_v5 }
 0x39b   : > { %v1827_v7 = vpop.eup %1826 }
 0x39c   : > { %v1113_v13 = vmul.f32 %v1827_v7, %v1819_v49  ;;  %v1816_v49 = vld [vmem:[%s2183_s4] sm:$0xff]  }
 0x39e   : > { %v1117_v19 = vpack.c.bf16 %v1113_v13, %v1113_v13 }
 0x3a0   : > { %v1105_v11 = vpop.xlane.xlu0 %1104 }
 0x3a1   : > { %1830 = vrcp.f32 %v1105_v11 }
 0x3a2   : > { %1832 = vrcp.f32 %v1108_v10 }
 0x3a4   : > { %v1829_v12 = vpop.eup %1828 }
 0x3a5   : > { %v1114_v8 = vmul.f32 %v1829_v12, %v1823_v55 }
 0x3a7   : > { %v1118_v24 = vpack.c.bf16 %v1114_v8, %v1114_v8 }
 0x3ab   : > { %v1831_v22 = vpop.eup %1830 }
 0x3ac   : > { %v1833_v25 = vpop.eup %1832  ;;  %v1115_v28 = vmul.f32 %v1831_v22, %v1825_v58 }
 0x3ad   : > { %v1116_v29 = vmul.f32 %v1833_v25, %v1821_v54 }
 0x3ae   : > { %v1119_v30 = vpack.c.bf16 %v1115_v28, %v1115_v28 }
 0x3af   : > { %v1120_v31 = vpack.c.bf16 %v1116_v29, %v1116_v29 }
 0x3bf   : > { %v765_v9 = vpop.trf.xlu1 }
 0x3c0   : > { %v877_v14 = vpack.c.bf16 %v765_v9, %v765_v9  ;;  %v797_v15 = vpop.trf.xlu0 }
 0x3c1   : > { %v878_v16 = vpack.c.bf16 %v797_v15, %v797_v15 }
 0x3c2   : > { %v1126_v6 = vsel %vm1124_vm3, %v877_v14, 0 }
 0x3c3   : > { %v1172_v17 = vsel %vm1124_vm3, %v878_v16, 0  ;;  %1721 = vmatpush3.bf16.msra.mxu1 %v1126_v6  ;;  %v861_v18 = vpop.trf.xlu1 }
 0x3c4   : > { %1727 = vmatpush3.bf16.msra.mxu0 %v1172_v17  ;;  %v829_v20 = vpop.trf.xlu0  ;;  %v880_v21 = vpack.c.bf16 %v861_v18, %v861_v18  ;;  %1732 = vmatprep.subr.bf16.mxu1 %v1899_v40 }
 0x3c5   : > { %v879_v23 = vpack.c.bf16 %v829_v20, %v829_v20  ;;  %1738 = vmatprep.subr.bf16.mxu0 %v1899_v40 }
 0x3c6   : > { %1723 = vmatmul.mubr.msk.bf16.vlgmr.msra.gmra.mrb[12].mxu1 %vm888_vm2, %v1117_v19  ;;  %v1264_v26 = vsel %vm1124_vm3, %v880_v21, 0 }
 0x3c7   : > { %v1218_v27 = vsel %vm1124_vm3, %v879_v23, 0  ;;  %1729 = vmatmul.mubr.msk.bf16.vlgmr.msra.gmra.mrb[16].mxu0 %vm888_vm2, %v1118_v24  ;;  %1734 = vmatprep.mubr.msk.bf16.mxu1 %vm1900_vm1, %v1899_v40 }
 0x3c8   : > { %1733 = vmatpush3.bf16.msra.mxu1 %v1218_v27  ;;  %1739 = vmatpush3.bf16.msra.mxu0 %v1264_v26 }
 0x3c9   : > { %1740 = vmatprep.mubr.msk.bf16.mxu0 %vm1900_vm1, %v1899_v40  ;;  %1744 = vmatprep.subr.bf16.mxu1 %v1899_v40 }
 0x3ce   : > { %1735 = vmatmul.mubr.msk.bf16.vlgmr.msra.gmra.mrb[16].mxu1 %vm888_vm2, %v1119_v30 }
 0x3cf   : > { %1741 = vmatmul.mubr.msk.bf16.vlgmr.msra.gmra.mrb[20].mxu0 %vm888_vm2, %v1120_v31  ;;  %1748 = vmatprep.mubr.msk.bf16.mxu1 %vm1900_vm1, %v1899_v40 }
 0x3d0   : > { %1745 = vmatpush3.bf16.msra.mxu1 %v1816_v49 }
 0x3d1   : > { %1746 = vmatprep.subr.bf16.mxu1 %v1899_v40  ;;  %v1644_v40 = vld [vmem:[%s2184_s5] ss:$0 sm:$0xff] }
 0x3d4   : > { %1747 = vmatpush3.bf16.msra.mxu1 %v1817_v50 }
 0x499   : > { %v1162_v32 = vpop.f32.mrb[12].mxu1 }
 0x49a   : > { %1306 = vxpose.xlu0.b32.start.end [1/1] (short) (narrow) %v1162_v32, 8  ;;  %v1724_v33 = vpop.f32.mrb[13].mxu1  ;;  %v1208_v34 = vpop.f32.mrb[16].mxu0 }
 0x49b   : > { %v1165_v35 = vpop.f32.mrb[14].mxu1  ;;  %1338 = vxpose.xlu1.b32.start.end [1/1] (short) (narrow) %v1208_v34, 8  ;;  %v1730_v36 = vpop.f32.mrb[17].mxu0 }
 0x49c   : > { %v1725_v37 = vpop.f32.mrb[15].mxu1  ;;  %v1211_v38 = vpop.f32.mrb[18].mxu0 }
 0x49d   : > { %v1731_v39 = vpop.f32.mrb[19].mxu0 }
 0x4a1   : > { %v1254_v41 = vpop.f32.mrb[16].mxu1 }
 0x4a2   : > { %1370 = vxpose.xlu0.b32.start.end [1/1] (short) (narrow) %v1254_v41, 8  ;;  %v1736_v42 = vpop.f32.mrb[17].mxu1  ;;  %v1300_v43 = vpop.f32.mrb[20].mxu0 }
 0x4a3   : > { %v1257_v44 = vpop.f32.mrb[18].mxu1  ;;  %1402 = vxpose.xlu1.b32.start.end [1/1] (short) (narrow) %v1300_v43, 8  ;;  %v1742_v45 = vpop.f32.mrb[21].mxu0 }
 0x4a4   : > { %v1737_v46 = vpop.f32.mrb[19].mxu1  ;;  %v1303_v47 = vpop.f32.mrb[22].mxu0 }
 0x4a5   : > { %v1743_v48 = vpop.f32.mrb[23].mxu0 }
 0x51a   : > { %v1322_v51 = vpop.trf.xlu0 }
 0x51b   : > { %1434 = vxpose.xlu0.b32.start [1/4] (short) (narrow) %v1322_v51, 8  ;;  %v1354_v52 = vpop.trf.xlu1 }
 0x51f   : > { %1435 = vxpose.xlu0.b32.cont [2/4] (short) (narrow) %v1354_v52, 8 }
 0x522   : > { %v1386_v53 = vpop.trf.xlu0 }
 0x523   : > { %1436 = vxpose.xlu0.b32.cont [3/4] (short) (narrow) %v1386_v53, 8  ;;  %v1418_v54 = vpop.trf.xlu1 }
 0x527   : > { %1437 = vxpose.xlu0.b32.end [4/4] (short) (narrow) %v1418_v54, 8 }
 0x59b   : > { %v1450_v55 = vpop.trf.xlu0 }
 0x59c   : > { %v1466_v56 = vpack.c.bf16 %v1450_v55, %v1450_v55 }
 0x59e   : > { %1749 = vmatmul.mubr.msk.bf16.vlgmr.msra.gmra.mrb[20].mxu1 %vm385_vm0, %v1466_v56 }
 0x671   : > { %v1527_v57 = vpop.f32.mrb[20].mxu1 }
 0x672   : > { %v1528_v58 = vadd.f32 %v1644_v40, %v1527_v57  ;;  %v1750_v59 = vpop.f32.mrb[21].mxu1 }
 0x673   : > { %v1530_v60 = vpop.f32.mrb[22].mxu1 }
 0x674   : > { %v1751_v61 = vpop.f32.mrb[23].mxu1  ;;  %1533 = vst.msk [vmem:[%s255_s18] sm:$0xff] %vm385_vm0, %v1528_v58 }
 0x675   : > { %1847 = shalt.err (!%p1844_p3)
}
 0x676   : > { %s1848_s13 = scalar_lea.hbm %s2136_s28, 128  ;;  %s1852_s16 = scalar_lea.hbm %s2185_s6, 256 }
 0x677   : > { %p1849_p4 = scmp.ne.s32.totalorder %s2136_s28, %s1848_s13  ;;  %p1853_p9 = scmp.lt.u32.totalorder %s2136_s28, %s2185_s6 }
 0x678   : > { %p1854_p10 = scmp.lt.u32.totalorder %s1852_s16, %s1848_s13  ;;  %p1856_p12 = scmp.lt.u32.totalorder %s1848_s13, %s2136_s28 }
 0x679   : > { %p1850_p7 = pnand %p1849_p4, %p1975_p5 }
 0x67a   : > { %p1855_p11 = por %p1854_p10, %p1853_p9 }
 0x67b   : > { %p1851_p8 = pneg %p1850_p7 }
 0x67c   : > { %p1857_p13 = por %p1856_p12, %p1855_p11 }
 0x67e   : > { %p1858_p0 = pnand %p1857_p13, %p1851_p8 }
 0x680   : > { %1861 = shalt.err (!%p1858_p0)
}
 0x681   : > { %1752 = dma.vmem_to_hbm [thread:$0]  (%p1975_p5), %s2138_s19, 128, %s2136_s28, %s1535_s25  }
 0x682 PF: > { %p1758_p1 = scmp.ge.s32.totalorder %s1896_s24, 2  ;;  %s1560_s18 = sand.u32 1, %s1884_s21  }
 0x683   : > { %s1561_s20 = scalar_lea.sflag [#allocation3], %s1560_s18 }
 0x684   : > { %p1755_p2 = pnand %p1758_p1, %p1979_p6 }
 0x686   : > { %1879 = dma.done.wait (!%p1755_p2), %s1561_s20, 128  }
 0x687   : > { %1881 = vsyncadd (!%p1755_p2), %s1561_s20, 4294967168  ;;  %p16_p3 = scmp.ge.s32.totalorder %s1962_s27, 4   ;;  %s2188_s21 = smov %s1888_s22 }
 0x688   : > { %s2189_s22 = smov %s1892_s23  ;;  %s2190_s23 = smov %s1973_s30 }
 0x689   : > { %s2191_s24 = smov %s1962_s27  ;;  %18 = sbr.rel (!%p16_p3) target bundleno = 3 (0x3), region = 82 }
 0x690   :  { %1566 = vsyncpa [#allocation3], 1 }
 0x691   :  { %1568 = vsyncpa [#allocation3 + $0x1], 1 }

</bundles_post_ra>
